<compile_context>
chip_gen: v5e
topology: v5e:2x2
jax: 0.10.0
libtpu: 0.0.40
codegen_flags: <defaults>
</compile_context>

<pallas_src>
import jax
import jax.numpy as jnp
from jax.experimental import pallas as pl
from jax.experimental.pallas import tpu as pltpu

_LANES = 128          # vreg lane width
_MAX_TILE_ROWS = 1024 # 1024 * 128 * 4 B = 512 KiB per tile buffer


def _round_up(a: int, b: int) -> int:
    return ((a + b - 1) // b) * b


def _linreg_kernel(m_ref, c_ref, x_ref, o_ref):
    # m_ref, c_ref: (1,) f32 scalars in SMEM.
    # x_ref, o_ref: (tile_rows, 128) f32 tiles in VMEM.
    m = m_ref[0]
    c = c_ref[0]
    o_ref[...] = m * x_ref[...] + c


def linear_regression_forward(x, m, c, *, max_tile_rows: int = _MAX_TILE_ROWS):
    """y = m * x + c computed in a Pallas TPU kernel.

    x: (N, 1) float32; m, c: (1,) float32 parameters. Returns (N, 1) float32.
    """
    n, one = x.shape
    assert one == 1, "expected a column vector like the PyTorch module's input"

    # --- lane-dense (rows, 128) slab with padding -------------------------
    rows = -(-n // _LANES)                                  # cdiv(n, 128)
    tile_rows = min(max_tile_rows, _round_up(rows, 8))      # keep (8,128) tiling
    rows_pad = _round_up(rows, tile_rows)
    n_pad = rows_pad * _LANES

    flat = jnp.pad(x.reshape(-1), (0, n_pad - n))
    slab = flat.reshape(rows_pad, _LANES)

    grid = (rows_pad // tile_rows,)

    out_slab = pl.pallas_call(
        _linreg_kernel,
        out_shape=jax.ShapeDtypeStruct((rows_pad, _LANES), x.dtype),
        grid=grid,
        in_specs=[
            pl.BlockSpec(memory_space=pltpu.SMEM),                    # m
            pl.BlockSpec(memory_space=pltpu.SMEM),                    # c
            pl.BlockSpec((tile_rows, _LANES), lambda i: (i, 0)),      # x tile
        ],
        out_specs=pl.BlockSpec((tile_rows, _LANES), lambda i: (i, 0)),
        compiler_params=pltpu.CompilerParams(
            dimension_semantics=("parallel",),  # shard row loop across TCs on v7x
        ),
        cost_estimate=pl.CostEstimate(
            flops=2 * n_pad,                 # one mul + one add per element
            transcendentals=0,
            bytes_accessed=2 * n_pad * 4,    # read x + write y (f32)
        ),
    )(m, c, slab)

    # --- strip padding, restore (N, 1) ------------------------------------
    return out_slab.reshape(-1)[:n].reshape(n, 1)


if __name__ == "__main__":
    N = 100
    key = jax.random.PRNGKey(0)
    kx, km, kc = jax.random.split(key, 3)

    # Input mimics np.random.rand(N, 1); parameters mimic torch.rand(1).
    x = jax.random.uniform(kx, (N, 1), dtype=jnp.float32)
    m = jax.random.uniform(km, (1,), dtype=jnp.float32)
    c = jax.random.uniform(kc, (1,), dtype=jnp.float32)

    y = linear_regression_forward(x, m, c)
    y = jax.block_until_ready(y)

    # Correctness check against plain-JAX reference.
    y_ref = m * x + c
    assert y.shape == (N, 1) and y.dtype == jnp.float32
    assert jnp.allclose(y, y_ref, atol=1e-6, rtol=1e-6)

    print("KERNEL_OK")
</pallas_src>

<mosaic_0001>
module attributes {stable_mosaic.version = 11 : i64} {
  func.func @_linreg_kernel(%arg0: i32, %arg1: memref<1xf32, #tpu.memory_space<smem>>, %arg2: memref<1xf32, #tpu.memory_space<smem>>, %arg3: memref<8x128xf32, #tpu.memory_space<vmem>>, %arg4: memref<8x128xf32, #tpu.memory_space<vmem>>) attributes {dimension_semantics = [#tpu.dimension_semantics<parallel>], iteration_bounds = array<i64: 1>, scalar_prefetch = 0 : i64, scratch_operands = 0 : i64, tpu.core_type = #tpu.core_type<tc>, window_params = [{transform_indices = @transform_0, window_bounds = array<i64: 1>}, {transform_indices = @transform_1, window_bounds = array<i64: 1>}, {transform_indices = @transform_2, window_bounds = array<i64: 8, 128>}, {transform_indices = @transform_3, window_bounds = array<i64: 8, 128>}]} {
    %c0 = arith.constant 0 : index
    %0 = memref.load %arg1[%c0] : memref<1xf32, #tpu.memory_space<smem>>
    %c0_0 = arith.constant 0 : index
    %1 = memref.load %arg2[%c0_0] : memref<1xf32, #tpu.memory_space<smem>>
    %c0_1 = arith.constant 0 : index
    %c0_2 = arith.constant 0 : index
    %2 = vector.load %arg3[%c0_1, %c0_2] : memref<8x128xf32, #tpu.memory_space<vmem>>, vector<8x128xf32>
    %3 = vector.broadcast %0 : f32 to vector<8x128xf32>
    %4 = arith.mulf %3, %2 : vector<8x128xf32>
    %5 = vector.broadcast %1 : f32 to vector<8x128xf32>
    %6 = arith.addf %4, %5 : vector<8x128xf32>
    %c0_3 = arith.constant 0 : index
    %c0_4 = arith.constant 0 : index
    %7 = vector.load %arg4[%c0_3, %c0_4] : memref<8x128xf32, #tpu.memory_space<vmem>>, vector<8x128xf32>
    tpu.vector_store %arg4[%c0_3, %c0_4], %6 {strides = array<i32>} : memref<8x128xf32, #tpu.memory_space<vmem>>, vector<8x128xf32>,
    return
  }
  func.func @transform_0(%arg0: i32) -> i32 {
    %c0_i32 = arith.constant 0 : i32
    %c0_i32_0 = arith.constant 0 : i32
    return %c0_i32 : i32
  }
  func.func @transform_1(%arg0: i32) -> i32 {
    %c0_i32 = arith.constant 0 : i32
    %c0_i32_0 = arith.constant 0 : i32
    return %c0_i32 : i32
  }
  func.func @transform_2(%arg0: i32) -> (i32, i32) {
    %c0_i32 = arith.constant 0 : i32
    %c0_i32_0 = arith.constant 0 : i32
    return %arg0, %c0_i32 : i32, i32
  }
  func.func @transform_3(%arg0: i32) -> (i32, i32) {
    %c0_i32 = arith.constant 0 : i32
    %c0_i32_0 = arith.constant 0 : i32
    return %arg0, %c0_i32 : i32, i32
  }
}

</mosaic_0001>

<bundles_post_ra>
// kernel: tpu_custom_call.1
= control target key start
LH: loop header
LB: loop body
LE: loop exit
PB: predicated region body
PF: predicated region fallthrough
CT: control target
= control target key end

     0   :  { %10 = vsyncpa [#allocation5], 0  ;;  %s144_s0 = inlined_call_operand.<no memory space> [shape: f32[1], index: 0, kind: input, shape index: {}]   ;;  %s145_s1 = inlined_call_operand.<no memory space> [shape: f32[1], index: 1, kind: input, shape index: {}]   ;;  %s146_s2 = inlined_call_operand.hbm [shape: f32[8,128], index: 2, kind: input, shape index: {}]   ;;  %s147_s3 = inlined_call_operand.hbm [shape: f32[8,128], index: 3, kind: output, shape index: {}]  }
   0x1   :  { %11 = vsyncpa [#allocation6], 0  ;;  %s21_s14 = sshll.u32 %s146_s2, 4  ;;  %s110_s15 = smov [#allocation4]   ;;  %s22_s14 = int_to_ptr.hbm [resolvable:$true] %s21_s14 }
   0x2   :  { %s23_s16 = sshll.u32 %s110_s15, 4  ;;  %s24_s16 = int_to_ptr.vmem [resolvable:$true] %s23_s16 }
   0x3   :  { %26 = dma.hbm_to_vmem [thread:$0]  %s22_s14, 128, %s24_s16, [#allocation5]  }
   0x4   :  { %106 = dma.done.wait [#allocation5], 128  }
   0x5   :  { %107 = vsyncadd [#allocation5], 4294967168  ;;  %v34_v0 = vstv %s144_s0  ;;  %v33_v1 = vld [vmem:[#allocation4] sm:$0xff]  ;;  %v36_v2 = vstv %s145_s1  ;;  %s111_s21 = smov [#allocation7]   ;;  %s46_s24 = sshll.u32 %s147_s3, 4  ;;  %s47_s24 = int_to_ptr.hbm [resolvable:$true] %s46_s24 }
   0x6   :  { %s44_s22 = sshll.u32 %s111_s21, 4  ;;  %v35_v3 = vmul.f32 %v34_v0, %v33_v1  ;;  %s45_s22 = int_to_ptr.vmem [resolvable:$true] %s44_s22 }
   0x8   :  { %v37_v4 = vadd.f32 %v36_v2, %v35_v3 }
   0xa   :  { %38 = vst [vmem:[#allocation7] sm:$0xff] %v37_v4 }
   0xb   :  { %49 = dma.vmem_to_hbm [thread:$0]  %s45_s22, 128, %s47_s24, [#allocation6]  }
   0xc   :  { %108 = dma.done.wait [#allocation6], 128  }
   0xd   :  { %109 = vsyncadd [#allocation6], 4294967168 }
   0xe   :  { %54 = vsyncpa [#allocation5], 1 }
   0xf   :  { %55 = vsyncpa [#allocation6], 1 }

</bundles_post_ra>
